<compile_context>
chip_gen: v5e
topology: v5e:2x2
jax: 0.10.0
libtpu: 0.0.40
codegen_flags: <defaults>
</compile_context>

<pallas_src>
import functools
import math

import jax
import jax.numpy as jnp
from jax.experimental import pallas as pl
from jax.experimental.pallas import tpu as pltpu


# ----------------------------------------------------------------------------
# Hardware-dependent knobs.
# ----------------------------------------------------------------------------
def _device_kind():
    try:
        return jax.devices()[0].device_kind.lower()
    except Exception:
        return ""


def _vmem_limit_bytes():
    """Scoped VMEM budget derived from the actual chip (v7x has only 64 MiB
    per TensorCore; v5e/v6e have 128 MiB). Leave headroom for Mosaic internal
    scratch."""
    try:
        cap = int(pltpu.get_tpu_info().vmem_capacity_bytes)
    except Exception:
        cap = 64 * 1024 * 1024  # conservative (v7x per-TC physical VMEM)
    return int(min(cap * 3 // 4, 96 * 1024 * 1024))


def _pick_tile(n, cap=256):
    """Largest multiple-of-8 divisor of n that is <= cap (full dim if n <= cap)."""
    if n <= cap:
        return n
    t = (cap // 8) * 8
    while t >= 8:
        if n % t == 0:
            return t
        t -= 8
    # TODO(synk): pad the sequence with a masked tail instead of a full-dim tile.
    return n


# ----------------------------------------------------------------------------
# Kernel 1a: QKV projection, self-attention fast path (q is k is v).
# One (Tr,E)@(E,3E) matmul per row tile; grid = (B, S//Tr).
# ----------------------------------------------------------------------------
def _proj_self_kernel(x_ref, w_ref, b_ref, o_ref, *, emb_dim, lane_fused):
    # x_ref: (1, Tr, E) f32; w_ref: (E, 3E) bf16; b_ref: (1, 3E) f32
    x = x_ref[0].astype(w_ref.dtype)
    y = jnp.dot(x, w_ref[...], preferred_element_type=jnp.float32) + b_ref[...]
    y = y.astype(o_ref.dtype)
    if lane_fused:
        o_ref[0] = y                                   # single lane-dense store
    else:
        for r in range(3):                             # (3, 1, Tr, E) role slabs
            o_ref[r, 0] = y[:, r * emb_dim:(r + 1) * emb_dim]


def _project_self_attn(x, w_qkv, b_qkv, *, tile_r, compute_dtype, lane_fused,
                       vmem_limit):
    B, S, E = x.shape
    n_r = S // tile_r
    kernel = functools.partial(_proj_self_kernel, emb_dim=E,
                               lane_fused=lane_fused)
    if lane_fused:
        out_shape = jax.ShapeDtypeStruct((B, S, 3 * E), compute_dtype)
        out_spec = pl.BlockSpec((1, tile_r, 3 * E), lambda b, i: (b, i, 0))
    else:
        out_shape = jax.ShapeDtypeStruct((3, B, S, E), compute_dtype)
        out_spec = pl.BlockSpec((3, 1, tile_r, E), lambda b, i: (0, b, i, 0))
    return pl.pallas_call(
        kernel,
        out_shape=out_shape,
        grid_spec=pltpu.PrefetchScalarGridSpec(
            num_scalar_prefetch=0,
            grid=(B, n_r),
            in_specs=[
                pl.BlockSpec((1, tile_r, E), lambda b, i: (b, i, 0)),
                pl.BlockSpec((E, 3 * E), lambda b, i: (0, 0)),
                pl.BlockSpec((1, 3 * E), lambda b, i: (0, 0)),
            ],
            out_specs=out_spec),
        compiler_params=pltpu.CompilerParams(
            dimension_semantics=("parallel", "parallel"),
            vmem_limit_bytes=vmem_limit),
        cost_estimate=pl.CostEstimate(
            flops=int(6 * B * S * E * E),
            transcendentals=0,
            bytes_accessed=int(B * S * E * 4 + 3 * E * E * 2
                               + 3 * B * S * E * 2)),
    )(x, w_qkv, b_qkv)


# ----------------------------------------------------------------------------
# Kernel 1b: QKV projection, general case (query / key / value may differ).
# q/k/v are three separate inputs (no activation stack); grid = (B, S//Tr).
# ----------------------------------------------------------------------------
def _proj_general_kernel(q_ref, k_ref, v_ref, w_ref, b_ref, o_ref,
                         *, emb_dim, lane_fused):
    # q/k/v_ref: (1, Tr, E) f32; w_ref: (3, E, E) bf16; b_ref: (1, 3E) f32
    E = emb_dim
    b_all = b_ref[...]
    xs = (q_ref[0], k_ref[0], v_ref[0])
    for r in range(3):
        y = jnp.dot(xs[r].astype(w_ref.dtype), w_ref[r],
                    preferred_element_type=jnp.float32) \
            + b_all[:, r * E:(r + 1) * E]
        y = y.astype(o_ref.dtype)
        if lane_fused:
            o_ref[0, :, r * E:(r + 1) * E] = y         # 128-aligned lane slab
        else:
            o_ref[r, 0] = y


def _project_general(query, key, value, w_stk, b_qkv, *, tile_r, compute_dtype,
                     lane_fused, vmem_limit):
    B, S, E = query.shape
    n_r = S // tile_r
    kernel = functools.partial(_proj_general_kernel, emb_dim=E,
                               lane_fused=lane_fused)
    if lane_fused:
        out_shape = jax.ShapeDtypeStruct((B, S, 3 * E), compute_dtype)
        out_spec = pl.BlockSpec((1, tile_r, 3 * E), lambda b, i: (b, i, 0))
    else:
        out_shape = jax.ShapeDtypeStruct((3, B, S, E), compute_dtype)
        out_spec = pl.BlockSpec((3, 1, tile_r, E), lambda b, i: (0, b, i, 0))
    row_spec = pl.BlockSpec((1, tile_r, E), lambda b, i: (b, i, 0))
    return pl.pallas_call(
        kernel,
        out_shape=out_shape,
        grid_spec=pltpu.PrefetchScalarGridSpec(
            num_scalar_prefetch=0,
            grid=(B, n_r),
            in_specs=[
                row_spec, row_spec, row_spec,
                pl.BlockSpec((3, E, E), lambda b, i: (0, 0, 0)),
                pl.BlockSpec((1, 3 * E), lambda b, i: (0, 0)),
            ],
            out_specs=out_spec),
        compiler_params=pltpu.CompilerParams(
            dimension_semantics=("parallel", "parallel"),
            vmem_limit_bytes=vmem_limit),
        cost_estimate=pl.CostEstimate(
            flops=int(6 * B * S * E * E),
            transcendentals=0,
            bytes_accessed=int(3 * B * S * E * 4 + 3 * E * E * 2
                               + 3 * B * S * E * 2)),
    )(query, key, value, w_stk, b_qkv)


# ----------------------------------------------------------------------------
# Kernel 2: flash-style attention + fused output projection.
# grid = (B, S//Tq, S//Tk); kv axis is the reduction ("arbitrary") axis.
# ----------------------------------------------------------------------------
def _flash_kernel(q_ref, k_ref, v_ref, wo_ref, bo_ref, o_ref,
                  acc_ref, m_ref, l_ref,
                  *, n_heads, head_dim, use_bf16_exp, lane_fused):
    ki = pl.program_id(2)

    @pl.when(ki == 0)
    def _init():
        m_ref[...] = jnp.full(m_ref.shape, -jnp.inf, dtype=m_ref.dtype)
        l_ref[...] = jnp.zeros(l_ref.shape, dtype=l_ref.dtype)
        acc_ref[...] = jnp.zeros(acc_ref.shape, dtype=acc_ref.dtype)

    if lane_fused:
        q, k, v = q_ref[0], k_ref[0], v_ref[0]          # (T, E) bf16
    else:
        q, k, v = q_ref[0, 0], k_ref[0, 0], v_ref[0, 0]

    for h in range(n_heads):
        sl = slice(h * head_dim, (h + 1) * head_dim)
        qh, kh, vh = q[:, sl], k[:, sl], v[:, sl]       # (T, hd) bf16
        # scores for this head: (Tq, Tk), f32 MXU accumulation.
        # NOTE: 1/sqrt(head_dim) is already folded into Wq/bq by the wrapper.
        s = jax.lax.dot_general(qh, kh, (((1,), (1,)), ((), ())),
                                preferred_element_type=jnp.float32)
        m_prev = m_ref[h]                               # (Tq, 1) f32
        m_new = jnp.maximum(m_prev, jnp.max(s, axis=-1, keepdims=True))
        alpha = jnp.exp(m_prev - m_new)                 # f32
        x = s - m_new
        if use_bf16_exp:
            # bf16 EUP (v6e/v7x): ~2x exp throughput; row-sum stays f32.
            p = jnp.exp(x.astype(jnp.bfloat16))
            p_sum = jnp.sum(p.astype(jnp.float32), axis=-1, keepdims=True)
        else:
            p = jnp.exp(x)
            p_sum = jnp.sum(p, axis=-1, keepdims=True)
        l_ref[h] = alpha * l_ref[h] + p_sum
        m_ref[h] = m_new
        pv = jnp.dot(p.astype(vh.dtype), vh,
                     preferred_element_type=jnp.float32)   # (Tq, hd) f32
        # direct per-head slab update (bounded live set, no concat per step)
        acc_ref[h] = alpha * acc_ref[h] + pv

    @pl.when(ki == pl.num_programs(2) - 1)
    def _finalize():
        # one concat per q tile (not per kv step); EUP reciprocal per q row
        ctx = jnp.concatenate(
            [acc_ref[h] * pl.reciprocal(l_ref[h], approx=True)
             for h in range(n_heads)], axis=-1).astype(wo_ref.dtype)
        out = jnp.dot(ctx, wo_ref[...],
                      preferred_element_type=jnp.float32) + bo_ref[...]
        o_ref[0] = out.astype(o_ref.dtype)


def _flash_attention(qkv, wo, bo, *, emb_dim, n_heads, head_dim, tile_q,
                     tile_k, out_dtype, use_bf16_exp, lane_fused, vmem_limit):
    E = emb_dim
    if lane_fused:
        B, S, _ = qkv.shape
        q_spec = pl.BlockSpec((1, tile_q, E), lambda b, qi, ki: (b, qi, 0))
        k_spec = pl.BlockSpec((1, tile_k, E), lambda b, qi, ki: (b, ki, 1))
        v_spec = pl.BlockSpec((1, tile_k, E), lambda b, qi, ki: (b, ki, 2))
    else:
        _, B, S, _ = qkv.shape
        q_spec = pl.BlockSpec((1, 1, tile_q, E), lambda b, qi, ki: (0, b, qi, 0))
        k_spec = pl.BlockSpec((1, 1, tile_k, E), lambda b, qi, ki: (1, b, ki, 0))
        v_spec = pl.BlockSpec((1, 1, tile_k, E), lambda b, qi, ki: (2, b, ki, 0))
    n_q = S // tile_q
    n_kv = S // tile_k
    kernel = functools.partial(_flash_kernel, n_heads=n_heads,
                               head_dim=head_dim, use_bf16_exp=use_bf16_exp,
                               lane_fused=lane_fused)
    return pl.pallas_call(
        kernel,
        out_shape=jax.ShapeDtypeStruct((B, S, E), out_dtype),
        grid_spec=pltpu.PrefetchScalarGridSpec(
            num_scalar_prefetch=0,
            grid=(B, n_q, n_kv),
            in_specs=[
                q_spec, k_spec, v_spec,
                pl.BlockSpec((E, E), lambda b, qi, ki: (0, 0)),   # Wo
                pl.BlockSpec((1, E), lambda b, qi, ki: (0, 0)),   # bo
            ],
            out_specs=pl.BlockSpec((1, tile_q, E), lambda b, qi, ki: (b, qi, 0)),
            scratch_shapes=[
                pltpu.VMEM((n_heads, tile_q, head_dim), jnp.float32),  # ctx acc
                pltpu.VMEM((n_heads, tile_q, 1), jnp.float32),         # run max
                pltpu.VMEM((n_heads, tile_q, 1), jnp.float32),         # run sum
            ]),
        compiler_params=pltpu.CompilerParams(
            dimension_semantics=("parallel", "parallel", "arbitrary"),
            vmem_limit_bytes=vmem_limit),
        cost_estimate=pl.CostEstimate(
            flops=int(4 * B * S * S * E + 2 * B * S * E * E),
            transcendentals=int(B * n_heads * S * S),
            bytes_accessed=int(3 * B * S * E * 2 + E * E * 2 + B * S * E * 4)),
    )(qkv, qkv, qkv, wo, bo)


# ----------------------------------------------------------------------------
# Public wrapper matching the PyTorch module's forward (mask=None, eval mode).
# ----------------------------------------------------------------------------
def multi_head_attention(query, key, value, params, *, n_heads,
                         compute_dtype=jnp.bfloat16):
    """query/key/value: (B, S, E) f32. params: PyTorch-layout weights."""
    B, S, E = query.shape
    # TODO(synk): key/value sequence length is assumed equal to query's.
    assert key.shape == query.shape and value.shape == query.shape
    head_dim = E // n_heads
    scale = 1.0 / math.sqrt(head_dim)

    kind = _device_kind()
    is_pre_v6 = any(t in kind for t in ("v2", "v3", "v4", "v5"))
    use_bf16_exp = any(t in kind for t in ("v6", "v7"))  # no bf16 EUP on v5e
    kv_cap = 128 if is_pre_v6 else 256                   # 128-wide MXU on v5e
    vmem_limit = _vmem_limit_bytes()

    # Single lane-dense (B, S, 3E) qkv slab when E is 128-aligned; otherwise
    # role-major (3, B, S, E) so every block keeps last dim == full E.
    lane_fused = (E % 128) == 0

    # PyTorch nn.Linear stores weight as (out, in); transpose so kernels do
    # x @ W.  Fold the softmax 1/sqrt(head_dim) scale into Wq/bq (free here,
    # saves H*Tq*Tk VALU multiplies per kv step in the flash kernel).
    wq = (params['wq'].T * scale).astype(compute_dtype)
    wk = params['wk'].T.astype(compute_dtype)
    wv = params['wv'].T.astype(compute_dtype)
    wo = params['wo'].T.astype(compute_dtype)
    bq = (params['bq'] * scale).reshape(1, E).astype(jnp.float32)
    bk = params['bk'].reshape(1, E).astype(jnp.float32)
    bv = params['bv'].reshape(1, E).astype(jnp.float32)
    bo = params['bo'].reshape(1, E).astype(jnp.float32)
    b_qkv = jnp.concatenate([bq, bk, bv], axis=1)        # (1, 3E) f32

    tile_r = _pick_tile(S, 256)       # projection row tile
    tile_q = _pick_tile(S, 256)       # query tile
    tile_k = _pick_tile(S, kv_cap)    # key/value tile (128 on v5e)

    if (query is key) and (key is value):
        # Self-attention: single fused (E, 3E) projection weight.
        w_qkv = jnp.concatenate([wq, wk, wv], axis=1)
        qkv = _project_self_attn(query, w_qkv, b_qkv, tile_r=tile_r,
                                 compute_dtype=compute_dtype,
                                 lane_fused=lane_fused, vmem_limit=vmem_limit)
    else:
        w_stk = jnp.stack([wq, wk, wv])                  # (3, E, E) bf16 only
        qkv = _project_general(query, key, value, w_stk, b_qkv, tile_r=tile_r,
                               compute_dtype=compute_dtype,
                               lane_fused=lane_fused, vmem_limit=vmem_limit)

    return _flash_attention(qkv, wo, bo, emb_dim=E, n_heads=n_heads,
                            head_dim=head_dim, tile_q=tile_q, tile_k=tile_k,
                            out_dtype=query.dtype, use_bf16_exp=use_bf16_exp,
                            lane_fused=lane_fused, vmem_limit=vmem_limit)


def _reference(query, key, value, params, *, n_heads):
    """Pure-JAX f32 reference mirroring the PyTorch forward (mask=None, eval)."""
    B, S, E = query.shape
    hd = E // n_heads
    lin = lambda x, w, b: x @ w.T + b
    Q = lin(query, params['wq'], params['bq']).reshape(B, S, n_heads, hd).transpose(0, 2, 1, 3)
    K = lin(key, params['wk'], params['bk']).reshape(B, S, n_heads, hd).transpose(0, 2, 1, 3)
    V = lin(value, params['wv'], params['bv']).reshape(B, S, n_heads, hd).transpose(0, 2, 1, 3)
    scores = jnp.einsum('bhqd,bhkd->bhqk', Q, K) / math.sqrt(hd)
    attn = jax.nn.softmax(scores, axis=-1)
    x = jnp.einsum('bhqk,bhkd->bhqd', attn, V).transpose(0, 2, 1, 3).reshape(B, S, E)
    return lin(x, params['wo'], params['bo'])


if __name__ == "__main__":
    def make_params(key, E):
        ks = jax.random.split(key, 8)
        bound = 1.0 / math.sqrt(E)
        names = ['wq', 'bq', 'wk', 'bk', 'wv', 'bv', 'wo', 'bo']
        params = {}
        for i, name in enumerate(names):
            shape = (E, E) if name.startswith('w') else (E,)
            params[name] = jax.random.uniform(ks[i], shape, jnp.float32,
                                              -bound, bound)
        return params

    root = jax.random.PRNGKey(0)
    # E=32 exercises the role-major (3,B,S,E) layout; E=128 exercises the
    # lane-dense (B,S,3E) layout.
    for (B, S, E, H) in [(2, 8, 32, 4), (2, 8, 128, 4)]:
        kp, kq, kk, kv_ = jax.random.split(jax.random.fold_in(root, E), 4)
        params = make_params(kp, E)
        query = jax.random.normal(kq, (B, S, E), jnp.float32)
        k_in = jax.random.normal(kk, (B, S, E), jnp.float32)
        v_in = jax.random.normal(kv_, (B, S, E), jnp.float32)

        # General (cross-attention-style) path: distinct q / k / v.
        out = jax.block_until_ready(
            multi_head_attention(query, k_in, v_in, params, n_heads=H))
        ref = _reference(query, k_in, v_in, params, n_heads=H)
        assert out.shape == (B, S, E)
        # bf16 matmuls (+ bf16 exp on v6e/v7x, approx reciprocal) vs f32 ref.
        assert jnp.allclose(out, ref, atol=5e-2, rtol=5e-2), \
            f"mismatch (general path, E={E})"

        # Self-attention path: fused (E, 3E) QKV projection.
        out_sa = jax.block_until_ready(
            multi_head_attention(query, query, query, params, n_heads=H))
        ref_sa = _reference(query, query, query, params, n_heads=H)
        assert jnp.allclose(out_sa, ref_sa, atol=5e-2, rtol=5e-2), \
            f"mismatch (self-attn path, E={E})"

    print("KERNEL_OK")
</pallas_src>

<mosaic_0001>
module attributes {stable_mosaic.version = 11 : i64} {
  func.func @_proj_general_kernel(%arg0: i32, %arg1: i32, %arg2: memref<1x8x32xf32, #tpu.memory_space<vmem>>, %arg3: memref<1x8x32xf32, #tpu.memory_space<vmem>>, %arg4: memref<1x8x32xf32, #tpu.memory_space<vmem>>, %arg5: memref<3x32x32xbf16, #tpu.memory_space<vmem>>, %arg6: memref<1x96xf32, #tpu.memory_space<vmem>>, %arg7: memref<3x1x8x32xbf16, #tpu.memory_space<vmem>>) attributes {dimension_semantics = [#tpu.dimension_semantics<parallel>, #tpu.dimension_semantics<parallel>], iteration_bounds = array<i64: 2, 1>, scalar_prefetch = 0 : i64, scratch_operands = 0 : i64, tpu.core_type = #tpu.core_type<tc>, window_params = [{transform_indices = @transform_0, window_bounds = array<i64: 1, 8, 32>}, {transform_indices = @transform_1, window_bounds = array<i64: 1, 8, 32>}, {transform_indices = @transform_2, window_bounds = array<i64: 1, 8, 32>}, {pipeline_mode = #tpu.pipeline_mode<synchronous>, transform_indices = @transform_3, window_bounds = array<i64: 3, 32, 32>}, {pipeline_mode = #tpu.pipeline_mode<synchronous>, transform_indices = @transform_4, window_bounds = array<i64: 1, 96>}, {transform_indices = @transform_5, window_bounds = array<i64: 3, 1, 8, 32>}]} {
    %c0 = arith.constant 0 : index
    %c0_0 = arith.constant 0 : index
    %0 = vector.load %arg6[%c0, %c0_0] : memref<1x96xf32, #tpu.memory_space<vmem>>, vector<1x96xf32>
    %c0_1 = arith.constant 0 : index
    %c0_2 = arith.constant 0 : index
    %c0_3 = arith.constant 0 : index
    %1 = vector.load %arg2[%c0_1, %c0_2, %c0_3] : memref<1x8x32xf32, #tpu.memory_space<vmem>>, vector<1x8x32xf32>
    %2 = vector.shape_cast %1 : vector<1x8x32xf32> to vector<8x32xf32>
    %c0_4 = arith.constant 0 : index
    %c0_5 = arith.constant 0 : index
    %c0_6 = arith.constant 0 : index
    %3 = vector.load %arg3[%c0_4, %c0_5, %c0_6] : memref<1x8x32xf32, #tpu.memory_space<vmem>>, vector<1x8x32xf32>
    %4 = vector.shape_cast %3 : vector<1x8x32xf32> to vector<8x32xf32>
    %c0_7 = arith.constant 0 : index
    %c0_8 = arith.constant 0 : index
    %c0_9 = arith.constant 0 : index
    %5 = vector.load %arg4[%c0_7, %c0_8, %c0_9] : memref<1x8x32xf32, #tpu.memory_space<vmem>>, vector<1x8x32xf32>
    %6 = vector.shape_cast %5 : vector<1x8x32xf32> to vector<8x32xf32>
    %7 = arith.truncf %2 : vector<8x32xf32> to vector<8x32xbf16>
    %c0_10 = arith.constant 0 : index
    %c0_11 = arith.constant 0 : index
    %c0_12 = arith.constant 0 : index
    %8 = vector.load %arg5[%c0_10, %c0_11, %c0_12] : memref<3x32x32xbf16, #tpu.memory_space<vmem>>, vector<1x32x32xbf16>
    %9 = vector.shape_cast %8 : vector<1x32x32xbf16> to vector<32x32xbf16>
    %cst = arith.constant dense<0.000000e+00> : vector<8x32xf32>
    %10 = tpu.matmul %7, %9, %cst {dimension_numbers = #tpu.dot_dimension_numbers<[1], [0], [0], [1], [0, 0, 1, 1], [], []>} : vector<8x32xbf16>, vector<32x32xbf16>, vector<8x32xf32> -> vector<8x32xf32>
    %11 = vector.extract_strided_slice %0 {offsets = [0, 0], sizes = [1, 32], strides = [1, 1]} : vector<1x96xf32> to vector<1x32xf32>
    %12 = vector.broadcast %11 : vector<1x32xf32> to vector<8x32xf32>
    %13 = arith.addf %10, %12 : vector<8x32xf32>
    %14 = arith.truncf %13 : vector<8x32xf32> to vector<8x32xbf16>
    %c0_13 = arith.constant 0 : index
    %c0_14 = arith.constant 0 : index
    %c0_15 = arith.constant 0 : index
    %c0_16 = arith.constant 0 : index
    %15 = vector.load %arg7[%c0_13, %c0_14, %c0_15, %c0_16] : memref<3x1x8x32xbf16, #tpu.memory_space<vmem>>, vector<1x1x8x32xbf16>
    %16 = vector.shape_cast %15 : vector<1x1x8x32xbf16> to vector<8x32xbf16>
    %17 = vector.shape_cast %14 : vector<8x32xbf16> to vector<1x1x8x32xbf16>
    tpu.vector_store %arg7[%c0_13, %c0_14, %c0_15, %c0_16], %17 {strides = array<i32>} : memref<3x1x8x32xbf16, #tpu.memory_space<vmem>>, vector<1x1x8x32xbf16>,
    %18 = arith.truncf %4 : vector<8x32xf32> to vector<8x32xbf16>
    %c1 = arith.constant 1 : index
    %c0_17 = arith.constant 0 : index
    %c0_18 = arith.constant 0 : index
    %19 = vector.load %arg5[%c1, %c0_17, %c0_18] : memref<3x32x32xbf16, #tpu.memory_space<vmem>>, vector<1x32x32xbf16>
    %20 = vector.shape_cast %19 : vector<1x32x32xbf16> to vector<32x32xbf16>
    %cst_19 = arith.constant dense<0.000000e+00> : vector<8x32xf32>
    %21 = tpu.matmul %18, %20, %cst_19 {dimension_numbers = #tpu.dot_dimension_numbers<[1], [0], [0], [1], [0, 0, 1, 1], [], []>} : vector<8x32xbf16>, vector<32x32xbf16>, vector<8x32xf32> -> vector<8x32xf32>
    %22 = vector.extract_strided_slice %0 {offsets = [0, 32], sizes = [1, 32], strides = [1, 1]} : vector<1x96xf32> to vector<1x32xf32>
    %23 = vector.broadcast %22 : vector<1x32xf32> to vector<8x32xf32>
    %24 = arith.addf %21, %23 : vector<8x32xf32>
    %25 = arith.truncf %24 : vector<8x32xf32> to vector<8x32xbf16>
    %c1_20 = arith.constant 1 : index
    %c0_21 = arith.constant 0 : index
    %c0_22 = arith.constant 0 : index
    %c0_23 = arith.constant 0 : index
    %26 = vector.load %arg7[%c1_20, %c0_21, %c0_22, %c0_23] : memref<3x1x8x32xbf16, #tpu.memory_space<vmem>>, vector<1x1x8x32xbf16>
    %27 = vector.shape_cast %26 : vector<1x1x8x32xbf16> to vector<8x32xbf16>
    %28 = vector.shape_cast %25 : vector<8x32xbf16> to vector<1x1x8x32xbf16>
    tpu.vector_store %arg7[%c1_20, %c0_21, %c0_22, %c0_23], %28 {strides = array<i32>} : memref<3x1x8x32xbf16, #tpu.memory_space<vmem>>, vector<1x1x8x32xbf16>,
    %29 = arith.truncf %6 : vector<8x32xf32> to vector<8x32xbf16>
    %c2 = arith.constant 2 : index
    %c0_24 = arith.constant 0 : index
    %c0_25 = arith.constant 0 : index
    %30 = vector.load %arg5[%c2, %c0_24, %c0_25] : memref<3x32x32xbf16, #tpu.memory_space<vmem>>, vector<1x32x32xbf16>
    %31 = vector.shape_cast %30 : vector<1x32x32xbf16> to vector<32x32xbf16>
    %cst_26 = arith.constant dense<0.000000e+00> : vector<8x32xf32>
    %32 = tpu.matmul %29, %31, %cst_26 {dimension_numbers = #tpu.dot_dimension_numbers<[1], [0], [0], [1], [0, 0, 1, 1], [], []>} : vector<8x32xbf16>, vector<32x32xbf16>, vector<8x32xf32> -> vector<8x32xf32>
    %33 = vector.extract_strided_slice %0 {offsets = [0, 64], sizes = [1, 32], strides = [1, 1]} : vector<1x96xf32> to vector<1x32xf32>
    %34 = vector.broadcast %33 : vector<1x32xf32> to vector<8x32xf32>
    %35 = arith.addf %32, %34 : vector<8x32xf32>
    %36 = arith.truncf %35 : vector<8x32xf32> to vector<8x32xbf16>
    %c2_27 = arith.constant 2 : index
    %c0_28 = arith.constant 0 : index
    %c0_29 = arith.constant 0 : index
    %c0_30 = arith.constant 0 : index
    %37 = vector.load %arg7[%c2_27, %c0_28, %c0_29, %c0_30] : memref<3x1x8x32xbf16, #tpu.memory_space<vmem>>, vector<1x1x8x32xbf16>
    %38 = vector.shape_cast %37 : vector<1x1x8x32xbf16> to vector<8x32xbf16>
    %39 = vector.shape_cast %36 : vector<8x32xbf16> to vector<1x1x8x32xbf16>
    tpu.vector_store %arg7[%c2_27, %c0_28, %c0_29, %c0_30], %39 {strides = array<i32>} : memref<3x1x8x32xbf16, #tpu.memory_space<vmem>>, vector<1x1x8x32xbf16>,
    return
  }
  func.func @transform_0(%arg0: i32, %arg1: i32) -> (i32, i32, i32) {
    %c0_i32 = arith.constant 0 : i32
    %c0_i32_0 = arith.constant 0 : i32
    return %arg0, %arg1, %c0_i32 : i32, i32, i32
  }
  func.func @transform_1(%arg0: i32, %arg1: i32) -> (i32, i32, i32) {
    %c0_i32 = arith.constant 0 : i32
    %c0_i32_0 = arith.constant 0 : i32
    return %arg0, %arg1, %c0_i32 : i32, i32, i32
  }
  func.func @transform_2(%arg0: i32, %arg1: i32) -> (i32, i32, i32) {
    %c0_i32 = arith.constant 0 : i32
    %c0_i32_0 = arith.constant 0 : i32
    return %arg0, %arg1, %c0_i32 : i32, i32, i32
  }
  func.func @transform_3(%arg0: i32, %arg1: i32) -> (i32, i32, i32) {
    %c0_i32 = arith.constant 0 : i32
    %c0_i32_0 = arith.constant 0 : i32
    %c0_i32_1 = arith.constant 0 : i32
    %c0_i32_2 = arith.constant 0 : i32
    return %c0_i32, %c0_i32_0, %c0_i32_1 : i32, i32, i32
  }
  func.func @transform_4(%arg0: i32, %arg1: i32) -> (i32, i32) {
    %c0_i32 = arith.constant 0 : i32
    %c0_i32_0 = arith.constant 0 : i32
    %c0_i32_1 = arith.constant 0 : i32
    return %c0_i32, %c0_i32_0 : i32, i32
  }
  func.func @transform_5(%arg0: i32, %arg1: i32) -> (i32, i32, i32, i32) {
    %c0_i32 = arith.constant 0 : i32
    %c0_i32_0 = arith.constant 0 : i32
    %c0_i32_1 = arith.constant 0 : i32
    return %c0_i32, %arg0, %arg1, %c0_i32_0 : i32, i32, i32, i32
  }
}

</mosaic_0001>

<bundles_post_ra>
// kernel: tpu_custom_call.1
= control target key start
LH: loop header
LB: loop body
LE: loop exit
PB: predicated region body
PF: predicated region fallthrough
CT: control target
= control target key end

     0   :  { %s1228_s0 = inlined_call_operand.hbm [shape: f32[2,8,32], index: 0, kind: input, shape index: {}]   ;;  %s1229_s1 = inlined_call_operand.hbm [shape: f32[2,8,32], index: 1, kind: input, shape index: {}]   ;;  %s1230_s2 = inlined_call_operand.hbm [shape: f32[2,8,32], index: 2, kind: input, shape index: {}]   ;;  %s1231_s3 = inlined_call_operand.hbm [shape: bf16[3,32,32], index: 3, kind: input, shape index: {}]   ;;  %s1232_s4 = inlined_call_operand.vmem [shape: f32[1,96], index: 4, kind: input, shape index: {}]   ;;  %s1233_s5 = inlined_call_operand.hbm [shape: bf16[3,2,8,32], index: 5, kind: output, shape index: {}]  }
   0x1   :  { %1240 = sst [smem:[#allocation20_spill]] %s1229_s1 }
   0x2   :  { %1241 = sst [smem:[#allocation21_spill]] %s1231_s3 }
   0x3   :  { %10 = vsyncpa [#allocation3], 0 }
   0x4   :  { %12 = vsyncpa [#allocation3 + $0x1], 0 }
   0x5   :  { %13 = vsyncpa [#allocation6], 0 }
   0x6   :  { %15 = vsyncpa [#allocation6 + $0x1], 0 }
   0x7   :  { %16 = vsyncpa [#allocation9], 0 }
   0x8   :  { %17 = vsyncpa [#allocation4], 0 }
   0x9   :  { %19 = vsyncpa [#allocation4 + $0x1], 0  ;;  %s1030_s18 = smov 0   ;;  %s1032_s19 = smov 0  }
   0xa   :  { %s1034_s20 = smov 0   ;;  %s1036_s21 = smov 0  }
   0xb   :  { %s1038_s22 = smov 0   ;;  %s1040_s23 = smov 0  }
   0xc LB: > { %1242 = sst [smem:[#allocation15_spill]] %s987_s22  ;;  %s1061_s24 = sadd.s32 4294967295, %s991_s23   ;;  %s991_s23 = sphi %s1040_s23, %s25_s23   ;;  %s987_s22 = sphi %s1038_s22, %s1260_s22   ;;  %s983_s21 = sphi %s1036_s21, %s1259_s21   ;;  %s979_s20 = sphi %s1034_s20, %s1263_s20   ;;  %s975_s19 = sphi %s1032_s19, %s1262_s19   ;;  %s971_s18 = sphi %s1030_s18, %s1261_s18  }
   0xd   : > { %1243 = sst [smem:[#allocation16_spill]] %s991_s23  ;;  %s637_s25 = sadd.s32 4294967294, %s991_s23  }
   0xe   : > { %s37_s26 = sadd.s32 1, %s987_s22  ;;  %s46_s27 = sadd.s32 1, %s979_s20 }
   0xf   : > { %p39_p0 = scmp.ge.s32.totalorder %s37_s26, 2  ;;  %p53_p1 = scmp.ne.s32.totalorder %s979_s20, %s975_s19 }
  0x10   : > { %p54_p2 = scmp.eq.s32.totalorder %s991_s23, 0  ;;  %p59_p3 = scmp.ne.s32.totalorder %s975_s19, %s971_s18 }
  0x11   : > { %s1265_s26 = smov (%p39_p0, %s37_s26), 0  ;;  %p183_p5 = scmp.eq.s32.totalorder %s1061_s24, 1 }
  0x12   : > { %1244 = sst [smem:[#allocation17_spill]] %s1265_s26  ;;  %p1073_p4 = por %p54_p2, %p53_p1 }
  0x13   : > { %s41_s29 = ssub.s32 %s987_s22, %s1265_s26  ;;  %p189_p6 = scmp.eq.s32.totalorder %s637_s25, 1 }
  0x14   : > { %p44_p7 = scmp.eq.s32.totalorder %s41_s29, 0  ;;  %p1080_p8 = por %p183_p5, %p53_p1 }
  0x15   : > { %p1087_p9 = por %p189_p6, %p59_p3  ;;  %p640_p10 = scmp.ge.s32.totalorder %s991_s23, 2 }
  0x16   : > { %s1092_s7 = scalar_select %p44_p7, %s979_s20, %s46_s27  }
  0x17   : > { %s1247_s6 = scalar_select %p1087_p9, 1, 0 }
  0x18   : > { %1249 = sst [smem:[#allocation19_spill]] %s1092_s7  ;;  %p722_p11 = scmp.lt.s32.totalorder %s991_s23, 2 }
  0x19   : > { %1248 = sst [smem:[#allocation18_spill]] %s1247_s6  ;;  %s1234_s8 = sand.u32 1, %s979_s20  }
  0x1a   : > { %s1098_s9 = sshll.u32 %s987_s22, 3  ;;  %s1102_s10 = sshll.u32 %s1234_s8, 3 }
  0x1b   : > { %p1106_p12 = pnand %p722_p11, %p1073_p4  ;;  %s246_s12 = sand.u32 1, %s991_s23  }
  0x1c   : > { %s1251_s1 = sld [smem:[#allocation20_spill]]  ;;  %s250_s16 = scalar_lea.vmem [#allocation5], %s1102_s10 }
  0x1d   : > { %s259_s17 = sshll.u32 %s250_s16, 4  ;;  %s1116_s27 = scalar_lea.sflag [#allocation6], %s246_s12  ;;  %s260_s17 = int_to_ptr.vmem [resolvable:$true] %s259_s17 }
  0x1e   : > { %p60_p13 = scmp.eq.s32.totalorder %s1061_s24, 0  ;;  %p638_p0 = scmp.ge.s32.totalorder %s991_s23, 1 }
  0x1f   : > { %p196_p1 = scmp.lt.s32.totalorder %s991_s23, 3  ;;  %s1253_s3 = sld [smem:[#allocation21_spill]] }
  0x20   : > { %p1129_p2 = por %p60_p13, %p59_p3  ;;  %s235_s29 = scalar_lea.hbm %s1228_s0, %s1098_s9 }
  0x21   : > { %p1136_p4 = pnand %p638_p0, %p196_p1  ;;  %s237_s13 = sshll.u32 %s235_s29, 4  ;;  %s238_s13 = int_to_ptr.hbm [resolvable:$true] %s237_s13 }
  0x22   : > { %s255_s15 = scalar_lea.hbm %s1251_s1, %s1098_s9  ;;  %s994_s8 = smov 64  }
  0x23   : > { %s257_s25 = sshll.u32 %s255_s15, 4  ;;  %p703_p5 = pneg %p1136_p4  ;;  %s258_s25 = int_to_ptr.hbm [resolvable:$true] %s257_s25 }
  0x24   : > { %713 = dma.hbm_to_vmem [thread:$0]  (!%p1106_p12), %s258_s25, 128, %s260_s17, %s1116_s27  }
  0x25   : > { %s207_s14 = sshll.u32 %s1253_s3, 4  ;;  %s993_s15 = smov [#allocation8]   ;;  %s208_s14 = int_to_ptr.hbm [resolvable:$true] %s207_s14 }
  0x26   : > { %s209_s16 = sshll.u32 %s993_s15, 4  ;;  %p704_p3 = pnand %p703_p5, %p60_p13  ;;  %s210_s16 = int_to_ptr.vmem [resolvable:$true] %s209_s16 }
  0x27   : > { %s995_s1 = smov 4   ;;  %s230_s3 = scalar_lea.vmem [#allocation2], %s1102_s10 }
  0x28   : > { %706 = dma.hbm_to_vmem [thread:$0]  (!%p704_p3), %s208_s14, 768, %s210_s16, [#allocation9], %s994_s8, %s994_s8, %s995_s1  }
  0x29   : > { %s239_s26 = sshll.u32 %s230_s3, 4  ;;  %s1255_s22 = sand.u32 1, %s979_s20   ;;  %s240_s26 = int_to_ptr.vmem [resolvable:$true] %s239_s26 }
  0x2a   : > { %s227_s7 = scalar_lea.sflag [#allocation3], %s1255_s22  ;;  %s275_s6 = scalar_lea.hbm %s1230_s2, %s1098_s9 }
  0x2b   : > { %710 = dma.hbm_to_vmem [thread:$0]  (!%p1106_p12), %s238_s13, 128, %s240_s26, %s227_s7  }
  0x2c   : > { %s270_s17 = scalar_lea.vmem [#allocation7], %s1102_s10  ;;  %s277_s29 = sshll.u32 %s275_s6, 4  ;;  %s278_s29 = int_to_ptr.hbm [resolvable:$true] %s277_s29 }
  0x2d   : > { %s279_s25 = sshll.u32 %s270_s17, 4  ;;  %288 = sbr.rel (%p1136_p4) target bundleno = 205 (0xcd), region = 40  ;;  %s280_s25 = int_to_ptr.vmem [resolvable:$true] %s279_s25 }
  0x2e   : > { %716 = dma.hbm_to_vmem [thread:$0]  (!%p1106_p12), %s278_s29, 128, %s280_s25, %s1116_s27  }
  0x2f   : > { %s1164_s1 = sand.u32 (!%p1136_p4), 1, %s975_s19  }
  0x30   : > { %s648_s3 = sshll.u32 (!%p1136_p4), %s1164_s1, 3  ;;  %s291_s22 = scalar_lea.sflag (!%p1136_p4), [#allocation3], %s1164_s1 }
  0x31   : > { %s294_s23 = scalar_lea.vmem (!%p1136_p4), [#allocation2], %s648_s3 }
  0x32   : > { %954 = dma.done.wait (%p1129_p2), %s291_s22, 128  }
  0x33   : > { %956 = vsyncadd (%p1129_p2), %s291_s22, 4294967168  ;;  %s300_s26 = sand.u32 1, %s1061_s24   ;;  %s304_s7 = scalar_lea.vmem [#allocation5], %s648_s3 }
  0x34   : > { %s301_s6 = scalar_lea.sflag [#allocation6], %s300_s26 }
  0x35   : > { %958 = dma.done.wait (%p1129_p2), %s301_s6, 256  }
  0x36   : > { %960 = vsyncadd (%p1129_p2), %s301_s6, 4294967040  ;;  %s314_s8 = scalar_lea.vmem [#allocation7], %s648_s3 }
  0x37   : > { %962 = dma.done.wait (%p60_p13), [#allocation9], 768  }
  0x38   : > { %964 = vsyncadd (%p60_p13), [#allocation9], 4294966528  ;;  %v685_v0 = vld [vmem:[#allocation8 + $0x8] sm:$0xff]  ;;  %v687_v1 = vld [vmem:[#allocation8 + $0x18] sm:$0xff]  ;;  %s996_s24 = smov 96   ;;  %vm382_vm0 = vcmask 261120  }
  0x39   : > { %v689_v2 = vld [vmem:[#allocation8 + $0x28] sm:$0xff]  ;;  %v684_v3 = vld [vmem:[#allocation8] sm:$0xff]  ;;  %v686_v4 = vld [vmem:[#allocation8 + $0x10] sm:$0xff]  ;;  %392 = vmatpush.bf16.msra.mxu0 %v685_v0  ;;  %432 = vmatpush.bf16.msra.mxu1 %v687_v1  ;;  %s997_s11 = smov 64   ;;  %s690_s27 = smul.u32 12, %s1164_s1  ;;  %vm400_vm1 = vcmask 257024  }
  0x3a   : > { %v688_v5 = vld [vmem:[#allocation8 + $0x20] sm:$0xff]  ;;  %v359_v6 = vld [vmem:[%s294_s23] sm:$0xff]  ;;  %472 = vmatpush.bf16.msra.mxu2 %v689_v2  ;;  %s681_s28 = sshll.u32 %s983_s21, 2  ;;  %s483_s21 = scalar_lea.sflag [#allocation4], %s1164_s1 }
  0x3b   : > { %v360_v7 = vld [vmem:[%s304_s7] sm:$0xff]  ;;  %v361_v8 = vld [vmem:[%s314_s8] sm:$0xff]  ;;  %v362_v10 = vpack.c.bf16 %v359_v6, %v359_v6  ;;  %s494_s16 = scalar_lea.hbm %s1233_s5, %s681_s28  ;;  %s356_s13 = scalar_lea.vmem [#allocation10], %s690_s27 }
  0x3c   : > { %v780_v9 = vld [vmem:[%s1232_s4] ss:$0 sm:$0xff]  ;;  %v402_v11 = vpack.c.bf16 %v360_v7, %v360_v7  ;;  %v442_v12 = vpack.c.bf16 %v361_v8, %v361_v8  ;;  %s495_s15 = sshll.u32 %s356_s13, 4  ;;  %s497_s17 = sshll.u32 %s494_s16, 4  ;;  %s496_s15 = int_to_ptr.vmem [resolvable:$true] %s495_s15  ;;  %s498_s17 = int_to_ptr.hbm [resolvable:$true] %s497_s17 }
  0x3d   : > { %420 = vrot.lane.b32.xlu0 %v780_v9, %s996_s24  ;;  %393 = vmatpush.bf16.msra.mxu0 %v684_v3  ;;  %s915_s25 = sshra.s32 %s498_s17, 4  ;;  %s921_s23 = scalar_lea.hbm %s1233_s5, 24  ;;  %s916_s25 = int_to_ptr.hbm [resolvable:$true] %s915_s25 }
  0x3e   : > { %433 = vmatpush.bf16.msra.mxu1 %v686_v4  ;;  %473 = vmatpush.bf16.msra.mxu2 %v688_v5  ;;  %s917_s29 = scalar_lea.hbm %s916_s25, 12  ;;  %p922_p12 = scmp.lt.s32.totalorder %s916_s25, %s1233_s5 }
  0x3f   : > { %p918_p6 = scmp.ne.s32.totalorder %s916_s25, %s917_s29  ;;  %p923_p13 = scmp.lt.s32.totalorder %s921_s23, %s917_s29 }
  0x40   : > { %660 = vmatmul.msk.bf16.vlgmr.msra.gmra.mxu0 %vm382_vm0, %v362_v10 }
  0x41   : > { %669 = vmatmul.msk.bf16.vlgmr.msra.gmra.mxu1 %vm382_vm0, %v402_v11  ;;  %679 = vmatmul.msk.bf16.vlgmr.msra.gmra.mxu2 %vm382_vm0, %v442_v12  ;;  %p919_p7 = pnand %p918_p6, %p1080_p8  ;;  %p924_p0 = por %p923_p13, %p922_p12 }
  0x43   : > { %p920_p11 = pneg %p919_p7 }
  0x45   : > { %460 = vrot.lane.b32.xlu0 %v780_v9, %s997_s11  ;;  %p925_p1 = pnand %p924_p0, %p920_p11 }
  0xaf   : > { %v421_v13 = vpop.permute.xlu0 %420 }
  0xb7   : > { %v461_v20 = vpop.permute.xlu0 %460 }
  0xbd   : > { %v395_v14 = vpop.f32.mrf.mxu0 }
  0xbe   : > { %v435_v15 = vpop.f32.mrf.mxu1  ;;  %v396_v16 = vadd.f32 %v780_v9, %v395_v14 }
  0xbf   : > { %v436_v17 = vadd.f32 %v435_v15, %v421_v13 }
  0xc0   : > { %v399_v18 = vpack.c.bf16 %v396_v16, %v396_v16 }
  0xc1   : > { %v439_v19 = vpack.c.bf16 %v436_v17, %v436_v17 }
  0xc2   : > { %401 = vst.msk [vmem:[%s356_s13] sm:$0xf] %vm400_vm1, %v399_v18 }
  0xc3   : > { %670 = vst.msk [vmem:[%s356_s13 + $0x4] sm:$0xf] %vm400_vm1, %v439_v19 }
  0xc4   : > { %v475_v21 = vpop.f32.mrf.mxu2 }
  0xc5   : > { %v476_v22 = vadd.f32 %v475_v21, %v461_v20  ;;  %v397_v23 = vpop.f32.mrf.mxu0 }
  0xc6   : > { %v437_v24 = vpop.f32.mrf.mxu1 }
  0xc7   : > { %v479_v25 = vpack.c.bf16 %v476_v22, %v476_v22 }
  0xc9   : > { %680 = vst.msk [vmem:[%s356_s13 + $0x8] sm:$0xf] %vm400_vm1, %v479_v25 }
  0xca   : > { %928 = shalt.err (!%p925_p1)
}
  0xcb   : > { %s998_s1 = smov 128   ;;  %s999_s7 = smov 4  }
  0xcc   : > { %701 = dma.vmem_to_hbm [thread:$0]  (%p1080_p8), %s496_s15, 192, %s498_s17, %s483_s21, %s997_s11, %s998_s1, %s999_s7   ;;  %v477_v26 = vpop.f32.mrf.mxu2 }
  0xcd PF: > { %s1257_s9 = sld [smem:[#allocation16_spill]]  ;;  %s512_s10 = sand.u32 1, %s971_s18  }
  0xce   : > { %p718_p2 = pnand %p640_p10, %p1087_p9  ;;  %s513_s24 = scalar_lea.sflag [#allocation4], %s512_s10 }
  0xd0   : > { %p719_p4 = pneg %p718_p2 }
  0xd2   : > { %966 = dma.done.wait (%p719_p4), %s513_s24, 192  }
  0xd3   : > { %968 = vsyncadd (%p719_p4), %s513_s24, 4294967104  ;;  %s25_s23 = sadd.s32 1, %s1257_s9   ;;  %s1258_s30 = sld [smem:[#allocation19_spill]] }
  0xd4   : > { %p22_p5 = scmp.ge.s32.totalorder %s25_s23, 4   ;;  %s1259_s21 = sld [smem:[#allocation15_spill]] }
  0xd5   : > { %s1260_s22 = sld [smem:[#allocation17_spill]]  ;;  %s1261_s18 = smov %s975_s19 }
  0xd6   : > { %s1262_s19 = smov %s979_s20  ;;  %24 = sbr.rel (!%p22_p5) target bundleno = 12 (0xc), region = 117 }
  0xd9   : > { %s1263_s20 = smov %s1258_s30 }
  0xdb   :  { %519 = vsyncpa [#allocation3], 1 }
  0xdc   :  { %521 = vsyncpa [#allocation3 + $0x1], 1 }
  0xdd   :  { %522 = vsyncpa [#allocation6], 1 }
  0xde   :  { %524 = vsyncpa [#allocation6 + $0x1], 1 }
  0xdf   :  { %525 = vsyncpa [#allocation9], 1 }
  0xe0   :  { %526 = vsyncpa [#allocation4], 1 }
  0xe1   :  { %528 = vsyncpa [#allocation4 + $0x1], 1 }

</bundles_post_ra>
